<compile_context>
chip_gen: v5e
topology: v5e:2x2
jax: 0.10.0
libtpu: 0.0.40
codegen_flags: <defaults>
</compile_context>

<pallas_src>
import functools

import jax
import jax.numpy as jnp
from jax import lax
from jax.experimental import pallas as pl
from jax.experimental.pallas import tpu as pltpu

EPS = 1e-5


# ----------------------------------------------------------------------------
# Fused Pallas kernel: expand -> depthwise 3x3 (stride 1) -> project (+res)
# ----------------------------------------------------------------------------
def _bottleneck_kernel(x_ref, w1_ref, s1_ref, b1_ref, w2_ref, s2_ref, b2_ref,
                       w3_ref, s3_ref, b3_ref, o_ref, *,
                       H, W, hid, THo, add_residual):
    t = pl.program_id(1)
    row0 = pl.multiple_of(t * THo, THo)        # first output row of this tile
    r0 = row0 - 1                              # first (halo) input row needed

    # ---- gather the THo+2 input rows (1-row halo; edge rows clamped, masked below)
    top = x_ref[pl.ds(jnp.maximum(r0, 0), 1), :]
    core = x_ref[pl.ds(row0, THo), :]          # always in range; also the residual
    bot = x_ref[pl.ds(jnp.minimum(row0 + THo, H - 1), 1), :]
    xin = jnp.concatenate([top, core, bot], axis=0).astype(jnp.float32)  # (THo+2, W*Cin)

    # ---- stage 1: 1x1 expand + BN1 + ReLU6, produced directly in the
    #      W-padded lane-flat layout (block-diagonal weight has zero halo cols).
    ye = jnp.dot(xin, w1_ref[...], preferred_element_type=jnp.float32)   # (THo+2, (W+2)*hid)
    ye = jnp.clip(ye * s1_ref[...] + b1_ref[...], 0.0, 6.0)
    ridx = r0 + lax.broadcasted_iota(jnp.int32, (THo + 2, 1), 0)
    ye = jnp.where((ridx >= 0) & (ridx < H), ye, 0.0)    # zero H-halo rows

    # ---- stage 2: 3x3 depthwise + BN2 + ReLU6 (stride 1), vectorized over W*hid lanes
    w2all = w2_ref[...]                                   # (9, W*hid)
    acc = jnp.zeros((THo, W * hid), jnp.float32)
    for ky in range(3):
        for kx in range(3):
            patch = lax.slice(ye, (ky, kx * hid), (ky + THo, (kx + W) * hid))
            acc = acc + patch * w2all[ky * 3 + kx: ky * 3 + kx + 1]
    acc = jnp.clip(acc * s2_ref[...] + b2_ref[...], 0.0, 6.0)

    # ---- stage 3: 1x1 project + BN3 (+ residual from the VMEM-resident input rows)
    out = jnp.dot(acc, w3_ref[...], preferred_element_type=jnp.float32)  # (THo, W*Cout)
    out = out * s3_ref[...] + b3_ref[...]
    if add_residual:
        out = out + core.astype(jnp.float32)
    o_ref[...] = out.astype(o_ref.dtype)


# ----------------------------------------------------------------------------
# Wrapper: parameter prep (weights only) + pallas_call
# ----------------------------------------------------------------------------
def _fold_bn(gamma, beta, mean, var):
    scale = gamma / jnp.sqrt(var + EPS)
    return scale, beta - mean * scale


def _pick_row_tile(H, N):
    # Largest multiple-of-8 divisor of H that still yields >= 4 grid steps
    # (pipelining depth; >= 2 steps per TensorCore on v7x).  Fall back to the
    # smallest multiple-of-8 divisor, then to the full height.
    divs = [d for d in range(8, H + 1, 8) if H % d == 0]
    if not divs:
        return H
    good = [d for d in divs if N * (H // d) >= 4]
    return max(good) if good else min(divs)


def linear_bottleneck_forward(x_nhwc, params, *, stride, inplanes, outplanes):
    """Fused LinearBottleneck forward.  x_nhwc: (N, H, W, inplanes) float32."""
    N, H, W, Cin = x_nhwc.shape
    hid = params["w1"].shape[1]
    Cout = outplanes

    s1, b1 = _fold_bn(*params["bn1"])
    s2, b2 = _fold_bn(*params["bn2"])
    s3, b3 = _fold_bn(*params["bn3"])

    # Block-diagonal / lane-tiled parameters (weight-only prep, done outside the
    # hot path; O(W^2 * C) bytes which is ~100 KB at these sizes).
    # TODO(synk): for very large W*C (e.g. 112x112x960 MobileNet layers) keep
    # per-channel weights and tile W too instead of block-diagonalising.
    eye_w = jnp.eye(W, dtype=jnp.float32)
    w1bd = jnp.einsum("uv,cj->ucvj", eye_w, params["w1"]).reshape(W * Cin, W * hid)
    w1bd = jnp.pad(w1bd, ((0, 0), (hid, hid)))           # zero W-halo output cols
    s1f = jnp.pad(jnp.tile(s1, W), (hid, hid)).reshape(1, (W + 2) * hid)
    b1f = jnp.pad(jnp.tile(b1, W), (hid, hid)).reshape(1, (W + 2) * hid)
    w2f = jnp.tile(params["w2"].reshape(9, 1, hid), (1, W, 1)).reshape(9, W * hid)
    s2f = jnp.tile(s2, W).reshape(1, W * hid)
    b2f = jnp.tile(b2, W).reshape(1, W * hid)
    w3bd = jnp.einsum("uv,cj->ucvj", eye_w, params["w3"]).reshape(W * hid, W * Cout)
    s3f = jnp.tile(s3, W).reshape(1, W * Cout)
    b3f = jnp.tile(b3, W).reshape(1, W * Cout)

    x3 = x_nhwc.reshape(N, H, W * Cin)                   # lane-flattened input
    add_res = (stride == 1 and inplanes == outplanes)
    THo = _pick_row_tile(H, N)

    kern = functools.partial(_bottleneck_kernel, H=H, W=W, hid=hid, THo=THo,
                             add_residual=add_res)

    def const_spec(shape):
        return pl.BlockSpec(shape, lambda n, t: (0, 0))

    out = pl.pallas_call(
        kern,
        out_shape=jax.ShapeDtypeStruct((N, H, W * Cout), x_nhwc.dtype),
        grid=(N, H // THo),
        in_specs=[
            pl.BlockSpec((None, H, W * Cin), lambda n, t: (n, 0, 0)),
            const_spec((W * Cin, (W + 2) * hid)),
            const_spec((1, (W + 2) * hid)),
            const_spec((1, (W + 2) * hid)),
            const_spec((9, W * hid)),
            const_spec((1, W * hid)),
            const_spec((1, W * hid)),
            const_spec((W * hid, W * Cout)),
            const_spec((1, W * Cout)),
            const_spec((1, W * Cout)),
        ],
        out_specs=pl.BlockSpec((None, THo, W * Cout), lambda n, t: (n, t, 0)),
        compiler_params=pltpu.CompilerParams(
            dimension_semantics=("parallel", "parallel")),
    )(x3, w1bd, s1f, b1f, w2f, s2f, b2f, w3bd, s3f, b3f)

    out = out.reshape(N, H, W, Cout)
    if stride != 1:
        # The kernel always runs the depthwise at stride 1; subsampling the
        # stride-1 result at [::stride] is exact for k=3 / pad=1 (and the
        # residual never applies when stride != 1).
        # TODO(synk): dedicated strided depthwise path to avoid the extra work.
        out = out[:, ::stride, ::stride, :]
    return out


# ----------------------------------------------------------------------------
# Pure-JAX reference (for correctness check)
# ----------------------------------------------------------------------------
def _reference_forward(x_nhwc, params, *, stride, inplanes, outplanes):
    hid = params["w1"].shape[1]
    dn = ("NHWC", "HWIO", "NHWC")

    def bn(y, p):
        g, b, m, v = p
        return (y - m) / jnp.sqrt(v + EPS) * g + b

    out = lax.conv_general_dilated(
        x_nhwc, params["w1"].reshape(1, 1, inplanes, hid), (1, 1), "VALID",
        dimension_numbers=dn)
    out = jnp.clip(bn(out, params["bn1"]), 0.0, 6.0)
    out = lax.conv_general_dilated(
        out, params["w2"].reshape(3, 3, 1, hid), (stride, stride),
        ((1, 1), (1, 1)), dimension_numbers=dn, feature_group_count=hid)
    out = jnp.clip(bn(out, params["bn2"]), 0.0, 6.0)
    out = lax.conv_general_dilated(
        out, params["w3"].reshape(1, 1, hid, outplanes), (1, 1), "VALID",
        dimension_numbers=dn)
    out = bn(out, params["bn3"])
    if stride == 1 and inplanes == outplanes:
        out = out + x_nhwc
    return out


# ----------------------------------------------------------------------------
# main
# ----------------------------------------------------------------------------
if __name__ == "__main__":
    # Module config: inplanes=4, outplanes=4, stride=1, t=6 -> residual active.
    inplanes, outplanes, stride, t = 4, 4, 1, 6
    hid = inplanes * t
    N, H, W = 2, 16, 16

    key = jax.random.PRNGKey(0)
    ks = jax.random.split(key, 16)

    def bn_params(k, c):
        k0, k1, k2, k3 = jax.random.split(k, 4)
        gamma = jax.random.uniform(k0, (c,), jnp.float32, 0.5, 1.5)
        beta = 0.1 * jax.random.normal(k1, (c,), jnp.float32)
        mean = 0.1 * jax.random.normal(k2, (c,), jnp.float32)
        var = jax.random.uniform(k3, (c,), jnp.float32, 0.5, 1.5)
        return (gamma, beta, mean, var)

    params = {
        "w1": 0.1 * jax.random.normal(ks[0], (inplanes, hid), jnp.float32),
        "w2": 0.1 * jax.random.normal(ks[1], (3, 3, hid), jnp.float32),
        "w3": 0.1 * jax.random.normal(ks[2], (hid, outplanes), jnp.float32),
        "bn1": bn_params(ks[3], hid),
        "bn2": bn_params(ks[4], hid),
        "bn3": bn_params(ks[5], outplanes),
    }

    # Input in PyTorch NCHW convention, transposed to NHWC for the kernel.
    x_nchw = jax.random.normal(ks[6], (N, inplanes, H, W), jnp.float32)
    x_nhwc = jnp.transpose(x_nchw, (0, 2, 3, 1))

    out = linear_bottleneck_forward(
        x_nhwc, params, stride=stride, inplanes=inplanes, outplanes=outplanes)
    out = jax.block_until_ready(out)

    ref = _reference_forward(
        x_nhwc, params, stride=stride, inplanes=inplanes, outplanes=outplanes)
    assert out.shape == ref.shape
    assert jnp.allclose(out, ref, atol=2e-4, rtol=2e-4), (
        float(jnp.max(jnp.abs(out - ref))))

    print("KERNEL_OK")
</pallas_src>

<mosaic_0001>
module attributes {stable_mosaic.version = 11 : i64} {
  func.func @_bottleneck_kernel(%arg0: i32, %arg1: i32, %arg2: memref<1x16x64xf32, #tpu.memory_space<vmem>>, %arg3: memref<64x432xf32, #tpu.memory_space<vmem>>, %arg4: memref<1x432xf32, #tpu.memory_space<vmem>>, %arg5: memref<1x432xf32, #tpu.memory_space<vmem>>, %arg6: memref<9x384xf32, #tpu.memory_space<vmem>>, %arg7: memref<1x384xf32, #tpu.memory_space<vmem>>, %arg8: memref<1x384xf32, #tpu.memory_space<vmem>>, %arg9: memref<384x64xf32, #tpu.memory_space<vmem>>, %arg10: memref<1x64xf32, #tpu.memory_space<vmem>>, %arg11: memref<1x64xf32, #tpu.memory_space<vmem>>, %arg12: memref<1x8x64xf32, #tpu.memory_space<vmem>>) attributes {dimension_semantics = [#tpu.dimension_semantics<parallel>, #tpu.dimension_semantics<parallel>], iteration_bounds = array<i64: 2, 2>, scalar_prefetch = 0 : i64, scratch_operands = 0 : i64, tpu.core_type = #tpu.core_type<tc>, window_params = [{transform_indices = @transform_0, window_bounds = array<i64: 1, 16, 64>}, {pipeline_mode = #tpu.pipeline_mode<synchronous>, transform_indices = @transform_1, window_bounds = array<i64: 64, 432>}, {pipeline_mode = #tpu.pipeline_mode<synchronous>, transform_indices = @transform_2, window_bounds = array<i64: 1, 432>}, {pipeline_mode = #tpu.pipeline_mode<synchronous>, transform_indices = @transform_3, window_bounds = array<i64: 1, 432>}, {pipeline_mode = #tpu.pipeline_mode<synchronous>, transform_indices = @transform_4, window_bounds = array<i64: 9, 384>}, {pipeline_mode = #tpu.pipeline_mode<synchronous>, transform_indices = @transform_5, window_bounds = array<i64: 1, 384>}, {pipeline_mode = #tpu.pipeline_mode<synchronous>, transform_indices = @transform_6, window_bounds = array<i64: 1, 384>}, {pipeline_mode = #tpu.pipeline_mode<synchronous>, transform_indices = @transform_7, window_bounds = array<i64: 384, 64>}, {pipeline_mode = #tpu.pipeline_mode<synchronous>, transform_indices = @transform_8, window_bounds = array<i64: 1, 64>}, {pipeline_mode = #tpu.pipeline_mode<synchronous>, transform_indices = @transform_9, window_bounds = array<i64: 1, 64>}, {transform_indices = @transform_10, window_bounds = array<i64: 1, 8, 64>}]} {
    %c8_i32 = arith.constant 8 : i32
    %0 = arith.muli %arg1, %c8_i32 : i32
    %1 = tpu.assume_multiple %0, 8 : i32
    %c1_i32 = arith.constant 1 : i32
    %2 = arith.subi %1, %c1_i32 : i32
    %c0_i32 = arith.constant 0 : i32
    %3 = arith.maxsi %2, %c0_i32 : i32
    %c0 = arith.constant 0 : index
    %4 = arith.index_cast %3 : i32 to index
    %c0_0 = arith.constant 0 : index
    %5 = vector.load %arg2[%c0, %4, %c0_0] : memref<1x16x64xf32, #tpu.memory_space<vmem>>, vector<1x1x64xf32>
    %6 = vector.shape_cast %5 : vector<1x1x64xf32> to vector<1x64xf32>
    %c0_1 = arith.constant 0 : index
    %7 = arith.index_cast %1 : i32 to index
    %c0_2 = arith.constant 0 : index
    %8 = vector.load %arg2[%c0_1, %7, %c0_2] : memref<1x16x64xf32, #tpu.memory_space<vmem>>, vector<1x8x64xf32>
    %9 = vector.shape_cast %8 : vector<1x8x64xf32> to vector<8x64xf32>
    %c8_i32_3 = arith.constant 8 : i32
    %10 = arith.addi %1, %c8_i32_3 : i32
    %c15_i32 = arith.constant 15 : i32
    %11 = arith.minsi %10, %c15_i32 : i32
    %c0_4 = arith.constant 0 : index
    %12 = arith.index_cast %11 : i32 to index
    %c0_5 = arith.constant 0 : index
    %13 = vector.load %arg2[%c0_4, %12, %c0_5] : memref<1x16x64xf32, #tpu.memory_space<vmem>>, vector<1x1x64xf32>
    %14 = vector.shape_cast %13 : vector<1x1x64xf32> to vector<1x64xf32>
    %15 = tpu.concatenate %6, %9, %14 in 0 : vector<1x64xf32>, vector<8x64xf32>, vector<1x64xf32> -> vector<10x64xf32>
    %c0_6 = arith.constant 0 : index
    %c0_7 = arith.constant 0 : index
    %16 = vector.load %arg3[%c0_6, %c0_7] : memref<64x432xf32, #tpu.memory_space<vmem>>, vector<64x432xf32>
    %cst = arith.constant dense<0.000000e+00> : vector<10x432xf32>
    %17 = tpu.matmul %15, %16, %cst {dimension_numbers = #tpu.dot_dimension_numbers<[1], [0], [0], [1], [0, 0, 1, 1], [], []>} : vector<10x64xf32>, vector<64x432xf32>, vector<10x432xf32> -> vector<10x432xf32>
    %c0_8 = arith.constant 0 : index
    %c0_9 = arith.constant 0 : index
    %18 = vector.load %arg4[%c0_8, %c0_9] : memref<1x432xf32, #tpu.memory_space<vmem>>, vector<1x432xf32>
    %19 = vector.broadcast %18 : vector<1x432xf32> to vector<10x432xf32>
    %20 = arith.mulf %17, %19 : vector<10x432xf32>
    %c0_10 = arith.constant 0 : index
    %c0_11 = arith.constant 0 : index
    %21 = vector.load %arg5[%c0_10, %c0_11] : memref<1x432xf32, #tpu.memory_space<vmem>>, vector<1x432xf32>
    %22 = vector.broadcast %21 : vector<1x432xf32> to vector<10x432xf32>
    %23 = arith.addf %20, %22 : vector<10x432xf32>
    %cst_12 = arith.constant 0.000000e+00 : f32
    %cst_13 = arith.constant 6.000000e+00 : f32
    %24 = vector.broadcast %cst_12 : f32 to vector<10x432xf32>
    %25 = arith.maximumf %24, %23 : vector<10x432xf32>
    %26 = vector.broadcast %cst_13 : f32 to vector<10x432xf32>
    %27 = arith.minimumf %26, %25 : vector<10x432xf32>
    %28 = tpu.iota {dimensions = array<i32: 0>} : vector<10x1xi32>
    %29 = vector.broadcast %2 : i32 to vector<10x1xi32>
    %30 = arith.addi %29, %28 : vector<10x1xi32>
    %c0_i32_14 = arith.constant 0 : i32
    %31 = vector.broadcast %c0_i32_14 : i32 to vector<10x1xi32>
    %32 = arith.cmpi sge, %30, %31 : vector<10x1xi32>
    %c16_i32 = arith.constant 16 : i32
    %33 = vector.broadcast %c16_i32 : i32 to vector<10x1xi32>
    %34 = arith.cmpi slt, %30, %33 : vector<10x1xi32>
    %35 = arith.andi %32, %34 : vector<10x1xi1>
    %cst_15 = arith.constant 0.000000e+00 : f32
    %36 = vector.shape_cast %35 : vector<10x1xi1> to vector<10x1xi1>
    %37 = vector.broadcast %36 : vector<10x1xi1> to vector<10x432xi1>
    %38 = vector.broadcast %cst_15 : f32 to vector<10x432xf32>
    %39 = arith.select %37, %27, %38 : vector<10x432xi1>, vector<10x432xf32>
    %c0_16 = arith.constant 0 : index
    %c0_17 = arith.constant 0 : index
    %40 = vector.load %arg6[%c0_16, %c0_17] : memref<9x384xf32, #tpu.memory_space<vmem>>, vector<9x384xf32>
    %cst_18 = arith.constant 0.000000e+00 : f32
    %41 = vector.broadcast %cst_18 : f32 to vector<8x384xf32>
    %42 = vector.extract_strided_slice %39 {offsets = [0, 0], sizes = [8, 384], strides = [1, 1]} : vector<10x432xf32> to vector<8x384xf32>
    %43 = vector.extract_strided_slice %40 {offsets = [0, 0], sizes = [1, 384], strides = [1, 1]} : vector<9x384xf32> to vector<1x384xf32>
    %44 = vector.broadcast %43 : vector<1x384xf32> to vector<8x384xf32>
    %45 = arith.mulf %42, %44 : vector<8x384xf32>
    %46 = arith.addf %41, %45 : vector<8x384xf32>
    %47 = vector.extract_strided_slice %39 {offsets = [0, 24], sizes = [8, 384], strides = [1, 1]} : vector<10x432xf32> to vector<8x384xf32>
    %48 = vector.extract_strided_slice %40 {offsets = [1, 0], sizes = [1, 384], strides = [1, 1]} : vector<9x384xf32> to vector<1x384xf32>
    %49 = vector.broadcast %48 : vector<1x384xf32> to vector<8x384xf32>
    %50 = arith.mulf %47, %49 : vector<8x384xf32>
    %51 = arith.addf %46, %50 : vector<8x384xf32>
    %52 = vector.extract_strided_slice %39 {offsets = [0, 48], sizes = [8, 384], strides = [1, 1]} : vector<10x432xf32> to vector<8x384xf32>
    %53 = vector.extract_strided_slice %40 {offsets = [2, 0], sizes = [1, 384], strides = [1, 1]} : vector<9x384xf32> to vector<1x384xf32>
    %54 = vector.broadcast %53 : vector<1x384xf32> to vector<8x384xf32>
    %55 = arith.mulf %52, %54 : vector<8x384xf32>
    %56 = arith.addf %51, %55 : vector<8x384xf32>
    %57 = vector.extract_strided_slice %39 {offsets = [1, 0], sizes = [8, 384], strides = [1, 1]} : vector<10x432xf32> to vector<8x384xf32>
    %58 = vector.extract_strided_slice %40 {offsets = [3, 0], sizes = [1, 384], strides = [1, 1]} : vector<9x384xf32> to vector<1x384xf32>
    %59 = vector.broadcast %58 : vector<1x384xf32> to vector<8x384xf32>
    %60 = arith.mulf %57, %59 : vector<8x384xf32>
    %61 = arith.addf %56, %60 : vector<8x384xf32>
    %62 = vector.extract_strided_slice %39 {offsets = [1, 24], sizes = [8, 384], strides = [1, 1]} : vector<10x432xf32> to vector<8x384xf32>
    %63 = vector.extract_strided_slice %40 {offsets = [4, 0], sizes = [1, 384], strides = [1, 1]} : vector<9x384xf32> to vector<1x384xf32>
    %64 = vector.broadcast %63 : vector<1x384xf32> to vector<8x384xf32>
    %65 = arith.mulf %62, %64 : vector<8x384xf32>
    %66 = arith.addf %61, %65 : vector<8x384xf32>
    %67 = vector.extract_strided_slice %39 {offsets = [1, 48], sizes = [8, 384], strides = [1, 1]} : vector<10x432xf32> to vector<8x384xf32>
    %68 = vector.extract_strided_slice %40 {offsets = [5, 0], sizes = [1, 384], strides = [1, 1]} : vector<9x384xf32> to vector<1x384xf32>
    %69 = vector.broadcast %68 : vector<1x384xf32> to vector<8x384xf32>
    %70 = arith.mulf %67, %69 : vector<8x384xf32>
    %71 = arith.addf %66, %70 : vector<8x384xf32>
    %72 = vector.extract_strided_slice %39 {offsets = [2, 0], sizes = [8, 384], strides = [1, 1]} : vector<10x432xf32> to vector<8x384xf32>
    %73 = vector.extract_strided_slice %40 {offsets = [6, 0], sizes = [1, 384], strides = [1, 1]} : vector<9x384xf32> to vector<1x384xf32>
    %74 = vector.broadcast %73 : vector<1x384xf32> to vector<8x384xf32>
    %75 = arith.mulf %72, %74 : vector<8x384xf32>
    %76 = arith.addf %71, %75 : vector<8x384xf32>
    %77 = vector.extract_strided_slice %39 {offsets = [2, 24], sizes = [8, 384], strides = [1, 1]} : vector<10x432xf32> to vector<8x384xf32>
    %78 = vector.extract_strided_slice %40 {offsets = [7, 0], sizes = [1, 384], strides = [1, 1]} : vector<9x384xf32> to vector<1x384xf32>
    %79 = vector.broadcast %78 : vector<1x384xf32> to vector<8x384xf32>
    %80 = arith.mulf %77, %79 : vector<8x384xf32>
    %81 = arith.addf %76, %80 : vector<8x384xf32>
    %82 = vector.extract_strided_slice %39 {offsets = [2, 48], sizes = [8, 384], strides = [1, 1]} : vector<10x432xf32> to vector<8x384xf32>
    %83 = vector.extract_strided_slice %40 {offsets = [8, 0], sizes = [1, 384], strides = [1, 1]} : vector<9x384xf32> to vector<1x384xf32>
    %84 = vector.broadcast %83 : vector<1x384xf32> to vector<8x384xf32>
    %85 = arith.mulf %82, %84 : vector<8x384xf32>
    %86 = arith.addf %81, %85 : vector<8x384xf32>
    %c0_19 = arith.constant 0 : index
    %c0_20 = arith.constant 0 : index
    %87 = vector.load %arg7[%c0_19, %c0_20] : memref<1x384xf32, #tpu.memory_space<vmem>>, vector<1x384xf32>
    %88 = vector.broadcast %87 : vector<1x384xf32> to vector<8x384xf32>
    %89 = arith.mulf %86, %88 : vector<8x384xf32>
    %c0_21 = arith.constant 0 : index
    %c0_22 = arith.constant 0 : index
    %90 = vector.load %arg8[%c0_21, %c0_22] : memref<1x384xf32, #tpu.memory_space<vmem>>, vector<1x384xf32>
    %91 = vector.broadcast %90 : vector<1x384xf32> to vector<8x384xf32>
    %92 = arith.addf %89, %91 : vector<8x384xf32>
    %cst_23 = arith.constant 0.000000e+00 : f32
    %cst_24 = arith.constant 6.000000e+00 : f32
    %93 = vector.broadcast %cst_23 : f32 to vector<8x384xf32>
    %94 = arith.maximumf %93, %92 : vector<8x384xf32>
    %95 = vector.broadcast %cst_24 : f32 to vector<8x384xf32>
    %96 = arith.minimumf %95, %94 : vector<8x384xf32>
    %c0_25 = arith.constant 0 : index
    %c0_26 = arith.constant 0 : index
    %97 = vector.load %arg9[%c0_25, %c0_26] : memref<384x64xf32, #tpu.memory_space<vmem>>, vector<384x64xf32>
    %cst_27 = arith.constant dense<0.000000e+00> : vector<8x64xf32>
    %98 = tpu.matmul %96, %97, %cst_27 {dimension_numbers = #tpu.dot_dimension_numbers<[1], [0], [0], [1], [0, 0, 1, 1], [], []>} : vector<8x384xf32>, vector<384x64xf32>, vector<8x64xf32> -> vector<8x64xf32>
    %c0_28 = arith.constant 0 : index
    %c0_29 = arith.constant 0 : index
    %99 = vector.load %arg10[%c0_28, %c0_29] : memref<1x64xf32, #tpu.memory_space<vmem>>, vector<1x64xf32>
    %100 = vector.broadcast %99 : vector<1x64xf32> to vector<8x64xf32>
    %101 = arith.mulf %98, %100 : vector<8x64xf32>
    %c0_30 = arith.constant 0 : index
    %c0_31 = arith.constant 0 : index
    %102 = vector.load %arg11[%c0_30, %c0_31] : memref<1x64xf32, #tpu.memory_space<vmem>>, vector<1x64xf32>
    %103 = vector.broadcast %102 : vector<1x64xf32> to vector<8x64xf32>
    %104 = arith.addf %101, %103 : vector<8x64xf32>
    %105 = arith.addf %104, %9 : vector<8x64xf32>
    %c0_32 = arith.constant 0 : index
    %c0_33 = arith.constant 0 : index
    %c0_34 = arith.constant 0 : index
    %106 = vector.load %arg12[%c0_32, %c0_33, %c0_34] : memref<1x8x64xf32, #tpu.memory_space<vmem>>, vector<1x8x64xf32>
    %107 = vector.shape_cast %106 : vector<1x8x64xf32> to vector<8x64xf32>
    %108 = vector.shape_cast %105 : vector<8x64xf32> to vector<1x8x64xf32>
    tpu.vector_store %arg12[%c0_32, %c0_33, %c0_34], %108 {strides = array<i32>} : memref<1x8x64xf32, #tpu.memory_space<vmem>>, vector<1x8x64xf32>,
    return
  }
  func.func @transform_0(%arg0: i32, %arg1: i32) -> (i32, i32, i32) {
    %c0_i32 = arith.constant 0 : i32
    %c0_i32_0 = arith.constant 0 : i32
    %c0_i32_1 = arith.constant 0 : i32
    return %arg0, %c0_i32, %c0_i32_0 : i32, i32, i32
  }
  func.func @transform_1(%arg0: i32, %arg1: i32) -> (i32, i32) {
    %c0_i32 = arith.constant 0 : i32
    %c0_i32_0 = arith.constant 0 : i32
    %c0_i32_1 = arith.constant 0 : i32
    return %c0_i32, %c0_i32_0 : i32, i32
  }
  func.func @transform_2(%arg0: i32, %arg1: i32) -> (i32, i32) {
    %c0_i32 = arith.constant 0 : i32
    %c0_i32_0 = arith.constant 0 : i32
    %c0_i32_1 = arith.constant 0 : i32
    return %c0_i32, %c0_i32_0 : i32, i32
  }
  func.func @transform_3(%arg0: i32, %arg1: i32) -> (i32, i32) {
    %c0_i32 = arith.constant 0 : i32
    %c0_i32_0 = arith.constant 0 : i32
    %c0_i32_1 = arith.constant 0 : i32
    return %c0_i32, %c0_i32_0 : i32, i32
  }
  func.func @transform_4(%arg0: i32, %arg1: i32) -> (i32, i32) {
    %c0_i32 = arith.constant 0 : i32
    %c0_i32_0 = arith.constant 0 : i32
    %c0_i32_1 = arith.constant 0 : i32
    return %c0_i32, %c0_i32_0 : i32, i32
  }
  func.func @transform_5(%arg0: i32, %arg1: i32) -> (i32, i32) {
    %c0_i32 = arith.constant 0 : i32
    %c0_i32_0 = arith.constant 0 : i32
    %c0_i32_1 = arith.constant 0 : i32
    return %c0_i32, %c0_i32_0 : i32, i32
  }
  func.func @transform_6(%arg0: i32, %arg1: i32) -> (i32, i32) {
    %c0_i32 = arith.constant 0 : i32
    %c0_i32_0 = arith.constant 0 : i32
    %c0_i32_1 = arith.constant 0 : i32
    return %c0_i32, %c0_i32_0 : i32, i32
  }
  func.func @transform_7(%arg0: i32, %arg1: i32) -> (i32, i32) {
    %c0_i32 = arith.constant 0 : i32
    %c0_i32_0 = arith.constant 0 : i32
    %c0_i32_1 = arith.constant 0 : i32
    return %c0_i32, %c0_i32_0 : i32, i32
  }
  func.func @transform_8(%arg0: i32, %arg1: i32) -> (i32, i32) {
    %c0_i32 = arith.constant 0 : i32
    %c0_i32_0 = arith.constant 0 : i32
    %c0_i32_1 = arith.constant 0 : i32
    return %c0_i32, %c0_i32_0 : i32, i32
  }
  func.func @transform_9(%arg0: i32, %arg1: i32) -> (i32, i32) {
    %c0_i32 = arith.constant 0 : i32
    %c0_i32_0 = arith.constant 0 : i32
    %c0_i32_1 = arith.constant 0 : i32
    return %c0_i32, %c0_i32_0 : i32, i32
  }
  func.func @transform_10(%arg0: i32, %arg1: i32) -> (i32, i32, i32) {
    %c0_i32 = arith.constant 0 : i32
    %c0_i32_0 = arith.constant 0 : i32
    return %arg0, %arg1, %c0_i32 : i32, i32, i32
  }
}

</mosaic_0001>

<bundles_post_ra>
// kernel: tpu_custom_call.1
= control target key start
LH: loop header
LB: loop body
LE: loop exit
PB: predicated region body
PF: predicated region fallthrough
CT: control target
= control target key end

     0   :  { %s2291_s0 = inlined_call_operand.vmem [shape: f32[2,16,64], index: 0, kind: input, shape index: {}]   ;;  %s2292_s1 = inlined_call_operand.vmem [shape: f32[64,432], index: 1, kind: input, shape index: {}]   ;;  %s2293_s2 = inlined_call_operand.vmem [shape: f32[1,432], index: 2, kind: input, shape index: {}]   ;;  %s2294_s3 = inlined_call_operand.vmem [shape: f32[1,432], index: 3, kind: input, shape index: {}]   ;;  %s2295_s4 = inlined_call_operand.vmem [shape: f32[9,384], index: 4, kind: input, shape index: {}]   ;;  %s2296_s5 = inlined_call_operand.vmem [shape: f32[1,384], index: 5, kind: input, shape index: {}]   ;;  %s2297_s6 = inlined_call_operand.vmem [shape: f32[1,384], index: 6, kind: input, shape index: {}]   ;;  %s2298_s7 = inlined_call_operand.vmem [shape: f32[384,64], index: 7, kind: input, shape index: {}]   ;;  %s2299_s8 = inlined_call_operand.vmem [shape: f32[1,64], index: 8, kind: input, shape index: {}]   ;;  %s2300_s9 = inlined_call_operand.vmem [shape: f32[1,64], index: 9, kind: input, shape index: {}]   ;;  %s2301_s10 = inlined_call_operand.hbm [shape: f32[2,16,64], index: 10, kind: output, shape index: {}]  }
   0x1   :  { %2315 = sst [smem:[#allocation14_spill]] %s2291_s0 }
   0x2   :  { %15 = vsyncpa [#allocation3], 0 }
   0x3   :  { %17 = vsyncpa [#allocation3 + $0x1], 0  ;;  %s1522_s13 = smov 0   ;;  %s1524_s14 = smov 0  }
   0x4   :  { %s1526_s15 = smov 0   ;;  %s1528_s16 = smov 0  }
   0x5   :  { %s1530_s17 = smov 0   ;;  %s1532_s18 = smov 0  }
   0x6   :  { %s1534_s19 = smov 0   ;;  %s1536_s20 = smov 0  }
   0x7 LB: > { %2316 = sst [smem:[#allocation5_spill]] %s1433_s13  ;;  %s1262_s21 = sadd.s32 4294967295, %s1461_s20   ;;  %s1461_s20 = sphi %s1536_s20, %s23_s20   ;;  %s1457_s19 = sphi %s1534_s19, %s2348_s19   ;;  %s1453_s18 = sphi %s1532_s18, %s2344_s18   ;;  %s1449_s17 = sphi %s1530_s17, %s2343_s17   ;;  %s1445_s16 = sphi %s1528_s16, %s2342_s16   ;;  %s1441_s15 = sphi %s1526_s15, %s2341_s15   ;;  %s1437_s14 = sphi %s1524_s14, %s2347_s14   ;;  %s1433_s13 = sphi %s1522_s13, %s2346_s13  }
   0x8   : > { %2317 = sst [smem:[#allocation6_spill]] %s1441_s15  ;;  %s1263_s22 = sadd.s32 4294967294, %s1461_s20  }
   0x9   : > { %2318 = sst [smem:[#allocation7_spill]] %s1453_s18  ;;  %s32_s23 = sadd.s32 1, %s1453_s18 }
   0xa   : > { %2319 = sst [smem:[#allocation8_spill]] %s1457_s19  ;;  %p33_p0 = scmp.ge.s32.totalorder %s32_s23, 2 }
   0xb   : > { %2320 = sst [smem:[#allocation9_spill]] %s1461_s20  ;;  %s35_s24 = sadd.s32 1, %s1457_s19 }
   0xc   : > { %p269_p1 = scmp.ne.s32.totalorder %s1441_s15, %s1437_s14  ;;  %p270_p2 = scmp.eq.s32.totalorder %s1262_s21, 3 }
   0xd   : > { %s2350_s23 = smov (%p33_p0, %s32_s23), 0  ;;  %s2352_s24 = smov (!%p33_p0, %s35_s24), %s1457_s19 }
   0xe   : > { %2321 = sst [smem:[#allocation10_spill]] %s2350_s23  ;;  %s255_s25 = ssub.s32 %s1453_s18, %s2350_s23 }
   0xf   : > { %p1573_p3 = por %p270_p2, %p269_p1  ;;  %p37_p4 = scmp.ge.s32.totalorder %s2352_s24, 2 }
  0x10   : > { %p275_p5 = scmp.ne.s32.totalorder %s1437_s14, %s1433_s13  ;;  %p276_p6 = scmp.eq.s32.totalorder %s1263_s22, 3 }
  0x11   : > { %p1266_p7 = scmp.ge.s32.totalorder %s1461_s20, 1  ;;  %s2354_s24 = smov (%p37_p4, %s2352_s24), 0 }
  0x12   : > { %2323 = sst [smem:[#allocation11_spill]] %s2354_s24  ;;  %p1582_p8 = por %p276_p6, %p275_p5 }
  0x13   : > { %p329_p9 = scmp.lt.s32.totalorder %s1461_s20, 5  ;;  %s254_s28 = ssub.s32 %s1457_s19, %s2354_s24 }
  0x14   : > { %s2324_s27 = scalar_select %p1582_p8, 1, 0 }
  0x15   : > { %s259_s29 = sadd.s32 1, %s1441_s15  ;;  %s256_s30 = sor.u32 %s255_s25, %s254_s28 }
  0x16   : > { %2325 = sst [smem:[#allocation12_spill]] %s2324_s27  ;;  %p330_p10 = pnand %p1266_p7, %p329_p9 }
  0x17   : > { %p257_p11 = scmp.eq.s32.totalorder %s256_s30, 0  ;;  %p367_p12 = scmp.lt.s32.totalorder (!%p330_p10), %s1449_s17, 1 }
  0x18   : > { %333 = sbr.rel (%p330_p10) target bundleno = 514 (0x202), region = 60  ;;  %s1615_s23 = sshll.u32 (!%p330_p10), %s1445_s16, 3 }
  0x19   : > { %s1591_s11 = scalar_select %p257_p11, %s1441_s15, %s259_s29  }
  0x1a   : > { %s1626_s28 = sadd.s32 (!%p330_p10), 4294967295, %s1615_s23  ;;  %s2306_s21 = smov (!%p330_p10), 48  }
  0x1b   : > { %2326 = sst [smem:[#allocation13_spill]] %s1591_s11  ;;  %s2309_s18 = smov (!%p330_p10), 24  }
  0x1c   : > { %p374_p13 = scmp.gt.s32.totalorder (!%p330_p10), %s1626_s28, 0  ;;  %s2327_s0 = sld [smem:[#allocation14_spill]] (!%p330_p10) }
  0x1d   : > { %v422_v0 = vld [vmem:[%s2292_s1 + $0xe0] sm:$0xff]  ;;  %v423_v1 = vld [vmem:[%s2292_s1 + $0xe8] sm:$0xff]  ;;  %v424_v2 = vld [vmem:[%s2292_s1 + $0xf0] sm:$0xff]  ;;  %s368_s12 = scalar_select %p367_p12, %s1449_s17, 1  ;;  %vm391_vm0 = vcmask 1040384   ;;  %vm426_vm1 = vcmask 523264  }
  0x1e   : > { %441 = vmatpush.msra.mxu3 %v422_v0  ;;  %464 = vmatpush.msra.mxu1 %v423_v1  ;;  %v1605_v3 = vld [vmem:[%s2295_s4 + $0x8] sm:$0xff]  ;;  %v418_v4 = vld [vmem:[%s2292_s1 + $0xc0] sm:$0xff]  ;;  %v420_v8 = vld [vmem:[%s2292_s1 + $0xd0] sm:$0xff]  ;;  %s2328_s30 = sadd.s32 8, %s1615_s23  ;;  %s2331_s24 = sadd.s32 8, %s1615_s23  ;;  %v577_v1 = vlaneseq  ;;  %vm628_vm4 = vcmask 195584  }
  0x1f   : > { %v419_v5 = vld [vmem:[%s2292_s1 + $0xc8] sm:$0xff]  ;;  %487 = vmatpush.msra.mxu2 %v424_v2  ;;  %v662_v6 = vperm.slane %v1605_v3, 2  ;;  %v617_v7 = vperm.slane %v1605_v3, 1  ;;  %v414_v9 = vld [vmem:[%s2292_s1 + $0xa0] sm:$0xff]  ;;  %v738_v11 = vperm.slane %v1605_v3, 4  ;;  %v416_v12 = vld [vmem:[%s2292_s1 + $0xb0] sm:$0xff] }
  0x20   : > { %442 = vmatpush.msra.mxu3 %v418_v4  ;;  %465 = vmatpush.msra.mxu1 %v419_v5  ;;  %v415_v10 = vld [vmem:[%s2292_s1 + $0xa8] sm:$0xff]  ;;  %v410_v13 = vld [vmem:[%s2292_s1 + $0x80] sm:$0xff]  ;;  %v1649_v15 = vld [vmem:[%s2295_s4 + $0x10] sm:$0xff]  ;;  %s1285_s27 = sshll.u32 %s368_s12, 4  ;;  %p1664_p0 = scmp.lt.s32.totalorder %s2328_s30, 15  ;;  %v801_v37 = vperm.slane %v1605_v3, 5 }
  0x21   : > { %669 = vrot.lane.b32.xlu1 %v662_v6, %s2306_s21  ;;  %624 = vrot.lane.b32.xlu0 %v617_v7, %s2309_s18  ;;  %v411_v14 = vld [vmem:[%s2292_s1 + $0x88] sm:$0xff]  ;;  %v412_v16 = vld [vmem:[%s2292_s1 + $0x90] sm:$0xff]  ;;  %s2330_s12 = smov 24   ;;  %v663_v20 = vperm.slane %v1649_v15, 2  ;;  %v618_v21 = vperm.slane %v1649_v15, 1  ;;  %v739_v26 = vperm.slane %v1649_v15, 4 }
  0x22   : > { %488 = vmatpush.msra.mxu2 %v420_v8  ;;  %443 = vmatpush.msra.mxu3 %v414_v9  ;;  %v406_v17 = vld [vmem:[%s2292_s1 + $0x60] sm:$0xff]  ;;  %s1660_s21 = scalar_lea.vmem %s2327_s0, %s1285_s27  ;;  %v407_v18 = vld [vmem:[%s2292_s1 + $0x68] sm:$0xff]  ;;  %v408_v19 = vld [vmem:[%s2292_s1 + $0x70] sm:$0xff]  ;;  %s2356_s24 = smov (!%p1664_p0, %s2331_s24), 15  ;;  %v802_v42 = vperm.slane %v1649_v15, 5  ;;  %v896_v54 = vperm.slane %v1649_v15, 7  ;;  %v580_v7 = vstv %s1626_s28 }
  0x23   : > { %466 = vmatpush.msra.mxu1 %v415_v10  ;;  %745 = vrot.lane.b32.xlu2 %v738_v11, %s2330_s12  ;;  %s375_s29 = scalar_select %p374_p13, %s1626_s28, 0  ;;  %v402_v22 = vld [vmem:[%s2292_s1 + $0x40] sm:$0xff]  ;;  %v403_v24 = vld [vmem:[%s2292_s1 + $0x48] sm:$0xff]  ;;  %v404_v25 = vld [vmem:[%s2292_s1 + $0x50] sm:$0xff]  ;;  %v895_v55 = vperm.slane %v1605_v3, 7  ;;  %v578_v6 = vshrl.u32 %v577_v1, 7 }
  0x24   : > { %489 = vmatpush.msra.mxu2 %v416_v12  ;;  %444 = vmatpush.msra.mxu3 %v410_v13  ;;  %s1685_s25 = scalar_lea.vmem %s1660_s21, %s1615_s23  ;;  %v398_v27 = vld [vmem:[%s2292_s1 + $0x20] sm:$0xff]  ;;  %v399_v28 = vld [vmem:[%s2292_s1 + $0x28] sm:$0xff]  ;;  %v400_v29 = vld [vmem:[%s2292_s1 + $0x30] sm:$0xff]  ;;  %s2332_s15 = smov 48   ;;  %vm673_vm5 = vcmask 392192   ;;  %vm721_vm10 = vcmask 1046528  }
  0x25   : > { %467 = vmatpush.msra.mxu1 %v411_v14  ;;  %s376_s30 = scalar_lea.vmem %s1660_s21, %s375_s29  ;;  %v379_v23 = vld [vmem:[%s1685_s25] sm:$0xff]  ;;  %s383_s13 = scalar_lea.vmem %s1660_s21, %s2356_s24  ;;  %v395_v34 = vld [vmem:[%s2292_s1 + $0x8] sm:$0xff]  ;;  %v396_v35 = vld [vmem:[%s2292_s1 + $0x10] sm:$0xff]  ;;  %v581_v12 = vadd.s32 %v580_v7, %v578_v6  ;;  %vm878_vm11 = vcmask 1045504   ;;  %vm651_vm12 = vcmask 850944   ;;  %vm696_vm13 = vcmask 654336  }
  0x26   : > { %490 = vmatpush.msra.mxu2 %v412_v16  ;;  %445 = vmatpush.msra.mxu3 %v406_v17  ;;  %v386_v30 = vrot.slane %v379_v23, 7  ;;  %v394_v31 = vld [vmem:[%s2292_s1] sm:$0xff]  ;;  %v425_v38 = vld [vmem:[%s2292_s1 + $0xf8] sm:$0xff]  ;;  %v1361_v58 = vld [vmem:[%s2295_s4 + $0x28] ss:$0 sm:$0xff]  ;;  %s1465_s28 = smov 80  }
  0x27   : > { %468 = vmatpush.msra.mxu1 %v407_v18  ;;  %v377_v32 = vld [vmem:[%s376_s30] sm:$0x1]  ;;  %v421_v41 = vld [vmem:[%s2292_s1 + $0xd8] sm:$0xff]  ;;  %vm583_vm2 = vcmp.ge.s32.totalorder %v581_v12, 0  ;;  %vm585_vm3 = vcmp.lt.s32.totalorder %v581_v12, 16  ;;  %s1466_s22 = smov 104  }
  0x28   : > { %491 = vmatpush.msra.mxu2 %v408_v19  ;;  %446 = vmatpush.msra.mxu3 %v402_v22  ;;  %v1717_v33 = vld [vmem:[%s2295_s4] sm:$0xff]  ;;  %v392_v36 = vsel %vm391_vm0, %v377_v32, %v386_v30  ;;  %v417_v44 = vld [vmem:[%s2292_s1 + $0xb8] sm:$0xff]  ;;  %v579_v19 = vadd.s32 8, %v578_v6  ;;  %vm1827_vm6 = vmand %vm583_vm2, %vm585_vm3  ;;  %s1281_s18 = sshll.u32 %s1449_s17, 1  ;;  %s364_s24 = sand.u32 1, %s1437_s14  }
  0x29   : > { %671 = vrot.lane.b32.xlu1 %v663_v20, %s2332_s15  ;;  %626 = vrot.lane.b32.xlu0 %v618_v21, %s2330_s12  ;;  %v616_v39 = vperm.slane %v1717_v33, 1  ;;  %v384_v40 = vld [vmem:[%s383_s13] sm:$0x1]  ;;  %v413_v45 = vld [vmem:[%s2292_s1 + $0x98] sm:$0xff]  ;;  %v737_v48 = vperm.slane %v1717_v33, 4  ;;  %v661_v49 = vperm.slane %v1717_v33, 2  ;;  %s1179_s11 = sadd.s32 %s1445_s16, %s1281_s18 }
  0x2a   : > { %469 = vmatpush.msra.mxu1 %v403_v24  ;;  %492 = vmatpush.msra.mxu2 %v404_v25  ;;  %v389_v43 = vrot.slane %v384_v40, 7  ;;  %v409_v47 = vld [vmem:[%s2292_s1 + $0x78] sm:$0xff]  ;;  %v800_v51 = vperm.slane %v1717_v33, 5  ;;  %v1362_v56 = vld [vmem:[%s2295_s4 + $0x20] ss:$0 sm:$0xff]  ;;  %v894_v57 = vperm.slane %v1717_v33, 7 }
  0x2b   : > { %447 = vmatpush.msra.mxu3 %v398_v27  ;;  %747 = vrot.lane.b32.xlu2 %v739_v26, %s2330_s12  ;;  %v405_v50 = vld [vmem:[%s2292_s1 + $0x58] sm:$0xff]  ;;  %v1808_v5 = vld [vmem:[%s2293_s2] sm:$0xf]  ;;  %v864_v24 = vperm.slane %v1605_v3, 6  ;;  %s1267_s0 = sshll.u32 %s364_s24, 3  ;;  %s1282_s27 = sshll.u32 %s1179_s11, 3 }
  0x2c   : > { %470 = vmatpush.msra.mxu1 %v399_v28  ;;  %493 = vmatpush.msra.mxu2 %v400_v29  ;;  %v393_v46 = vsel %vm391_vm0, %v386_v30, %v389_v43  ;;  %v401_v52 = vld [vmem:[%s2292_s1 + $0x38] sm:$0xff]  ;;  %v1814_v8 = vld [vmem:[%s2294_s3] sm:$0xf]  ;;  %v528_v9 = vperm.slane %v1808_v5, 1  ;;  %v527_v16 = vperm.slane %v1808_v5, 0  ;;  %v529_v21 = vperm.slane %v1808_v5, 2  ;;  %s1181_s16 = scalar_lea.hbm %s2301_s10, %s1282_s27 }
  0x2d   : > { %448 = vmatpush.msra.mxu3 %v394_v31  ;;  %v397_v53 = vld [vmem:[%s2292_s1 + $0x18] sm:$0xff]  ;;  %v546_v11 = vperm.slane %v1814_v8, 1  ;;  %v545_v23 = vperm.slane %v1814_v8, 0  ;;  %v547_v26 = vperm.slane %v1814_v8, 2  ;;  %v582_v31 = vadd.s32 %v580_v7, %v579_v19  ;;  %s1185_s29 = sshll.u32 %s1181_s16, 4  ;;  %s1169_s20 = scalar_lea.sflag [#allocation3], %s364_s24  ;;  %s1186_s29 = int_to_ptr.hbm [resolvable:$true] %s1185_s29 }
  0x2e   : > { %471 = vmatpush.msra.mxu1 %v395_v34  ;;  %494 = vmatpush.msra.mxu2 %v396_v35  ;;  %v1363_v59 = vld [vmem:[%s2295_s4 + $0x18] ss:$0 sm:$0xff]  ;;  %s1381_s21 = sshra.s32 %s1186_s29, 4  ;;  %s1382_s21 = int_to_ptr.hbm [resolvable:$true] %s1381_s21 }
  0x2f   : > { %1272 = vmatmul.msk.f32.vlgmr.msra.gmra.mxu3 %vm426_vm1, %v392_v36  ;;  %1274 = vmatmul.msk.f32.vlgmr.msra.gmra.mxu1 %vm426_vm1, %v392_v36  ;;  %vm584_vm7 = vcmp.ge.s32.totalorder %v582_v31, 0  ;;  %vm586_vm8 = vcmp.lt.s32.totalorder %v582_v31, 16  ;;  %s1383_s30 = scalar_lea.hbm %s1382_s21, 8  ;;  %p1388_p5 = scmp.lt.s32.totalorder %s1382_s21, %s2301_s10 }
  0x30   : > { %1276 = vmatmul.msk.f32.vlgmr.msra.gmra.mxu2 %vm426_vm1, %v392_v36  ;;  %510 = vmatpush.msrb.mxu3 %v425_v38  ;;  %vm1852_vm9 = vmand %vm584_vm7, %vm586_vm8  ;;  %p1384_p1 = scmp.ne.s32.totalorder %s1382_s21, %s1383_s30 }
  0x31   : > { %808 = vrot.lane.b32.xlu1 %v801_v37, %s2332_s15  ;;  %622 = vrot.lane.b32.xlu0 %v616_v39, %s2330_s12 }
  0x32   : > { %511 = vmatpush.msrb.mxu3 %v421_v41  ;;  %p1385_p2 = pnand %p1384_p1, %p1573_p3 }
  0x33   : > { %810 = vrot.lane.b32.xlu2 %v802_v42, %s2332_s15 }
  0x34   : > { %512 = vmatpush.msrb.mxu3 %v417_v44  ;;  %p1386_p4 = pneg %p1385_p2 }
  0x36   : > { %513 = vmatpush.msrb.mxu3 %v413_v45 }
  0x37   : > { %1273 = vmatmul.msk.f32.gmra.mxu3 %vm426_vm1, %v393_v46  ;;  %1275 = vmatmul.msk.f32.gmra.mxu1 %vm426_vm1, %v393_v46 }
  0x38   : > { %1277 = vmatmul.msk.f32.gmra.mxu2 %vm426_vm1, %v393_v46  ;;  %514 = vmatpush.msrb.mxu3 %v409_v47 }
  0x39   : > { %743 = vrot.lane.b32.xlu1 %v737_v48, %s2330_s12  ;;  %667 = vrot.lane.b32.xlu0 %v661_v49, %s2332_s15 }
  0x3a   : > { %515 = vmatpush.msrb.mxu3 %v405_v50 }
  0x3b   : > { %806 = vrot.lane.b32.xlu2 %v800_v51, %s2332_s15 }
  0x3c   : > { %516 = vmatpush.msrb.mxu3 %v401_v52 }
  0x3e   : > { %517 = vmatpush.msrb.mxu3 %v397_v53 }
  0x3f   : > { %1278 = vmatmul.msk.f32.vlgmr.msrb.gmra.mxu3 %vm426_vm1, %v392_v36 }
  0x41   : > { %904 = vrot.lane.b32.xlu1 %v896_v54, %s2330_s12  ;;  %902 = vrot.lane.b32.xlu0 %v895_v55, %s2330_s12 }
  0x43   : > { %965 = vrot.lane.b32.xlu2 %v1362_v56, %s2332_s15 }
  0x47   : > { %1279 = vmatmul.msk.f32.gmra.mxu3 %vm426_vm1, %v393_v46 }
  0x49   : > { %900 = vrot.lane.b32.xlu1 %v894_v57, %s2330_s12  ;;  %967 = vrot.lane.b32.xlu0 %v1361_v58, %s2332_s15 }
  0x4b   : > { %963 = vrot.lane.b32.xlu2 %v1363_v59, %s2332_s15 }
  0x7d   : > { %v1801_v2 = vpop.permute.xlu2 %745 }
  0x85   : > { %v1821_v17 = vpop.permute.xlu2 %747 }
  0x8d   : > { %v1848_v46 = vpop.permute.xlu2 %810 }
  0x93   : > { %v1791_v60 = vpop.permute.xlu1 %669  ;;  %v1793_v61 = vpop.permute.xlu0 %624 }
  0x9b   : > { %v1795_v62 = vpop.permute.xlu1 %671  ;;  %v1797_v63 = vpop.permute.xlu0 %626 }
  0x9c   : > { %v675_v19 = vsel %vm673_vm5, %v1791_v60, %v1795_v62 }
  0xa3   : > { %v1799_v0 = vpop.permute.xlu1 %808  ;;  %v1803_v4 = vpop.permute.xlu0 %622 }
  0xa4   : > { %v629_v32 = vsel %vm628_vm4, %v1803_v4, %v1793_v61 }
  0xab   : > { %v1817_v10 = vpop.permute.xlu1 %743  ;;  %v1823_v20 = vpop.permute.xlu0 %667 }
  0xac   : > { %v473_v13 = vpop.f32.mrf.mxu1  ;;  %v674_v36 = vsel %vm673_vm5, %v1823_v20, %v1791_v60  ;;  %v548_v60 = vperm.slane %v1814_v8, 3 }
  0xad   : > { %v536_v14 = vmul.f32 %v528_v9, %v473_v13  ;;  %v630_v13 = vsel %vm628_vm4, %v1793_v61, %v1797_v63 }
  0xaf   : > { %v554_v18 = vadd.f32 %v546_v11, %v536_v14 }
  0xb1   : > { %v562_v22 = vmax.f32 %v554_v18, 0.0  ;;  %v530_v18 = vperm.slane %v1808_v5, 3  ;;  %v750_v5 = vsel %vm628_vm4, %v1801_v2, %v1821_v17 }
  0xb2   : > { %v450_v25 = vpop.f32.mrf.mxu3 }
  0xb3   : > { %v570_v27 = vmin.f32 %v562_v22, 6.0  ;;  %v535_v28 = vmul.f32 %v527_v16, %v450_v25  ;;  %v496_v29 = vpop.f32.mrf.mxu2  ;;  %v1832_v30 = vpop.permute.xlu1 %904  ;;  %v749_v22 = vsel %vm628_vm4, %v1817_v10, %v1801_v2 }
  0xb4   : > { %v537_v34 = vmul.f32 %v529_v21, %v496_v29  ;;  %v476_v35 = vpop.f32.mrf.mxu1  ;;  %v1850_v49 = vpop.permute.xlu0 %902 }
  0xb5   : > { %v1842_v37 = vsel %vm1827_vm6, %v570_v27, 0.0  ;;  %v553_v38 = vadd.f32 %v545_v23, %v535_v28  ;;  %v540_v39 = vmul.f32 %v528_v9, %v476_v35  ;;  %v813_v35 = vsel %vm673_vm5, %v1799_v0, %v1848_v46 }
  0xb6   : > { %v555_v40 = vadd.f32 %v547_v26, %v537_v34  ;;  %v681_v41 = vmul.f32 %v674_v36, %v1842_v37  ;;  %v636_v42 = vmul.f32 %v629_v32, %v1842_v37  ;;  %v807_v32 = vpop.permute.xlu2 %806  ;;  %v756_v2 = vmul.f32 %v749_v22, %v1842_v37 }
  0xb7   : > { %v561_v43 = vmax.f32 %v553_v38, 0.0  ;;  %v558_v44 = vadd.f32 %v546_v11, %v540_v39  ;;  %v812_v8 = vsel %vm673_vm5, %v807_v32, %v1799_v0 }
  0xb8   : > { %v563_v45 = vmax.f32 %v555_v40, 0.0  ;;  %690 = vrot.lane.b32.xlu1 %v681_v41, %s1465_s28  ;;  %645 = vrot.lane.b32.xlu2 %v636_v42, %s1466_s22  ;;  %v707_v42 = vperm.slane %v1605_v3, 3 }
  0xb9   : > { %v566_v47 = vmax.f32 %v558_v44, 0.0  ;;  %v569_v52 = vmin.f32 %v561_v43, 6.0  ;;  %v774_v44 = vrot.slane %v756_v2, 1 }
  0xba   : > { %v571_v48 = vmin.f32 %v563_v45, 6.0  ;;  %v453_v51 = vpop.f32.mrf.mxu3 }
  0xbb   : > { %v574_v53 = vmin.f32 %v566_v47, 6.0  ;;  %v539_v54 = vmul.f32 %v527_v16, %v453_v51  ;;  %v499_v55 = vpop.f32.mrf.mxu2  ;;  %v1856_v56 = vpop.permute.xlu1 %900  ;;  %v1874_v11 = vsel %vm1827_vm6, %v569_v52, 0.0  ;;  %v819_v47 = vmul.f32 %v812_v8, %v1842_v37 }
  0xbc   : > { %v541_v57 = vmul.f32 %v529_v21, %v499_v55  ;;  %v906_v58 = vsel %vm628_vm4, %v1856_v56, %v1850_v49  ;;  %v1867_v6 = vsel %vm1827_vm6, %v571_v48, 0.0  ;;  %v635_v61 = vmul.f32 %v1803_v4, %v1874_v11 }
  0xbd   : > { %v1863_v59 = vsel %vm1852_vm9, %v574_v53, 0.0  ;;  %v557_v1 = vadd.f32 %v545_v23, %v539_v54  ;;  %v1870_v9 = vmul.f32 %v906_v58, %v1842_v37  ;;  %v637_v21 = vmul.f32 %v630_v13, %v1867_v6 }
  0xbe   : > { %v559_v7 = vadd.f32 %v547_v26, %v541_v57  ;;  %v1877_v12 = vmul.f32 %v906_v58, %v1863_v59  ;;  %v682_v25 = vmul.f32 %v675_v19, %v1867_v6  ;;  %v760_v27 = vmul.f32 %v749_v22, %v1863_v59 }
  0xbf   : > { %v565_v14 = vmax.f32 %v557_v1, 0.0  ;;  %647 = vrot.lane.b32.xlu0 %v637_v21, %s1466_s22  ;;  %v757_v31 = vmul.f32 %v750_v5, %v1867_v6  ;;  %v680_v43 = vmul.f32 %v1823_v20, %v1874_v11  ;;  %v823_v48 = vmul.f32 %v812_v8, %v1863_v59 }
  0xc0   : > { %v567_v16 = vmax.f32 %v559_v7, 0.0  ;;  %692 = vrot.lane.b32.xlu2 %v682_v25, %s1465_s28  ;;  %643 = vrot.lane.b32.xlu1 %v635_v61, %s1466_s22  ;;  %v775_v36 = vrot.slane %v760_v27, 1  ;;  %v818_v54 = vmul.f32 %v807_v32, %v1874_v11  ;;  %v820_v57 = vmul.f32 %v813_v35, %v1867_v6 }
  0xc1   : > { %v573_v28 = vmin.f32 %v565_v14, 6.0  ;;  %v777_v38 = vrot.slane %v757_v31, 1  ;;  %v710_v58 = vmul.f32 %v707_v42, %v1842_v37  ;;  %v708_v1 = vperm.slane %v1649_v15, 3 }
  0xc2   : > { %v575_v23 = vmin.f32 %v567_v16, 6.0  ;;  %v519_v26 = vpop.f32.mrf.mxu3  ;;  %v776_v52 = vsel %vm721_vm10, %v774_v44, %v775_v36  ;;  %v912_v7 = vmul.f32 %v1856_v56, %v1874_v11  ;;  %v837_v16 = vrot.slane %v819_v47, 1 }
  0xc3   : > { %v538_v4 = vmul.f32 %v530_v18, %v519_v26  ;;  %v1915_v40 = vsel %vm1852_vm9, %v573_v28, 0.0  ;;  %v932_v19 = vrot.slane %v1877_v12, 2  ;;  %v838_v21 = vrot.slane %v823_v48, 1 }
  0xc4   : > { %v1901_v29 = vsel %vm1852_vm9, %v575_v23, 0.0  ;;  %v822_v20 = vmul.f32 %v807_v32, %v1915_v40  ;;  %v916_v13 = vmul.f32 %v1856_v56, %v1915_v40  ;;  %v834_v25 = vrot.slane %v818_v54, 1 }
  0xc5   : > { %v761_v34 = vmul.f32 %v750_v5, %v1901_v29  ;;  %v556_v41 = vadd.f32 %v548_v60, %v538_v4  ;;  %v824_v51 = vmul.f32 %v813_v35, %v1901_v29  ;;  %v706_v26 = vperm.slane %v1717_v33, 3 }
  0xc6   : > { %v835_v61 = vrot.slane %v822_v20, 1  ;;  %v840_v27 = vrot.slane %v820_v57, 1  ;;  %v755_v28 = vmul.f32 %v1817_v10, %v1874_v11  ;;  %v759_v56 = vmul.f32 %v1817_v10, %v1915_v40  ;;  %v966_v57 = vpop.permute.xlu2 %965 }
  0xc7   : > { %v778_v39 = vrot.slane %v761_v34, 1  ;;  %688 = vrot.lane.b32.xlu0 %v680_v43, %s1465_s28  ;;  %v564_v55 = vmax.f32 %v556_v41, 0.0  ;;  %v841_v22 = vrot.slane %v824_v51, 1  ;;  %v929_v4 = vrot.slane %v916_v13, 2 }
  0xc8   : > { %785 = vrot.lane.b32.xlu1 %v776_v52, %s1466_s22  ;;  %v865_v12 = vperm.slane %v1649_v15, 6  ;;  %v839_v31 = vsel %vm721_vm10, %v837_v16, %v838_v21  ;;  %v713_v34 = vmul.f32 %v707_v42, %v1863_v59  ;;  %v836_v35 = vsel %vm721_vm10, %v834_v25, %v835_v61 }
  0xc9   : > { %v779_v45 = vsel %vm721_vm10, %v777_v38, %v778_v39  ;;  %v572_v5 = vmin.f32 %v564_v55, 6.0  ;;  %v842_v32 = vsel %vm721_vm10, %v840_v27, %v841_v22  ;;  %v709_v10 = vmul.f32 %v706_v26, %v1874_v11 }
  0xca   : > { %v522_v0 = vpop.f32.mrf.mxu3  ;;  %787 = vrot.lane.b32.xlu2 %v779_v45, %s1466_s22  ;;  %v712_v36 = vmul.f32 %v706_v26, %v1915_v40  ;;  %v771_v39 = vrot.slane %v755_v28, 1  ;;  %v772_v41 = vrot.slane %v759_v56, 1  ;;  %v726_v43 = vrot.slane %v713_v34, 1 }
  0xcb   : > { %v542_v53 = vmul.f32 %v530_v18, %v522_v0  ;;  %v931_v18 = vrot.slane %v1870_v9, 2  ;;  %v725_v9 = vrot.slane %v710_v58, 1  ;;  %v596_v38 = vsel %vm1827_vm6, %v572_v5, 0.0 }
  0xcc   : > { %v722_v42 = vrot.slane %v709_v10, 1  ;;  %v723_v44 = vrot.slane %v712_v36, 1  ;;  %v711_v45 = vmul.f32 %v708_v1, %v1867_v6  ;;  %v907_v47 = vsel %vm628_vm4, %v1850_v49, %v1832_v30 }
  0xcd   : > { %v560_v14 = vadd.f32 %v548_v60, %v542_v53  ;;  %v928_v60 = vrot.slane %v912_v7, 2  ;;  %v1948_v2 = vsel %vm878_vm11, %v931_v18, %v932_v19  ;;  %v1964_v0 = vsel %vm721_vm10, %v725_v9, %v726_v43 }
  0xce   : > { %v638_v51 = vmul.f32 %v1797_v63, %v596_v38  ;;  %v1971_v52 = vsel %vm721_vm10, %v722_v42, %v723_v44  ;;  %v714_v53 = vmul.f32 %v708_v1, %v1901_v29  ;;  %v773_v54 = vsel %vm721_vm10, %v771_v39, %v772_v41  ;;  %v964_v10 = vpop.permute.xlu2 %963 }
  0xcf   : > { %v568_v23 = vmax.f32 %v560_v14, 0.0  ;;  %848 = vrot.lane.b32.xlu0 %v839_v31, %s1465_s28  ;;  %v930_v20 = vsel %vm878_vm11, %v928_v60, %v929_v4  ;;  %v918_v49 = vmul.f32 %v907_v47, %v1901_v29  ;;  %v868_v55 = vmul.f32 %v865_v12, %v1867_v6  ;;  %v968_v31 = vpop.permute.xlu0 %967 }
  0xd0   : > { %850 = vrot.lane.b32.xlu1 %v842_v32, %s1465_s28  ;;  %v728_v58 = vrot.slane %v711_v45, 1  ;;  %v729_v7 = vrot.slane %v714_v53, 1  ;;  %v871_v50 = vmul.f32 %v865_v12, %v1901_v29  ;;  %v863_v63 = vperm.slane %v1717_v33, 6 }
  0xd1   : > { %v576_v8 = vmin.f32 %v568_v23, 6.0  ;;  %v885_v14 = vrot.slane %v868_v55, 2  ;;  %v867_v1 = vmul.f32 %v864_v24, %v1842_v37  ;;  %v870_v16 = vmul.f32 %v864_v24, %v1863_v59 }
  0xd2   : > { %846 = vrot.lane.b32.xlu2 %v836_v35, %s1465_s28  ;;  %v1985_v18 = vsel %vm721_vm10, %v728_v58, %v729_v7  ;;  %v886_v19 = vrot.slane %v871_v50, 2  ;;  %v866_v21 = vmul.f32 %v863_v63, %v1874_v11  ;;  %v869_v22 = vmul.f32 %v863_v63, %v1915_v40 }
  0xd3   : > { %v600_v48 = vsel %vm1852_vm9, %v576_v8, 0.0  ;;  %v914_v23 = vmul.f32 %v907_v47, %v1867_v6  ;;  %v882_v25 = vrot.slane %v867_v1, 2  ;;  %v883_v61 = vrot.slane %v870_v16, 2 }
  0xd4   : > { %v825_v13 = vmul.f32 %v1848_v46, %v600_v48  ;;  %v821_v26 = vmul.f32 %v1848_v46, %v596_v38  ;;  %v1994_v5 = vsel %vm878_vm11, %v885_v14, %v886_v19  ;;  %v879_v27 = vrot.slane %v866_v21, 2 }
  0xd5   : > { %v880_v28 = vrot.slane %v869_v22, 2  ;;  %v1997_v56 = vsel %vm878_vm11, %v882_v25, %v883_v61  ;;  %v935_v60 = vrot.slane %v918_v49, 2  ;;  %v934_v12 = vrot.slane %v914_v23, 2  ;;  %v1095_v23 = vld [vmem:[%s2298_s7 + $0x178] sm:$0xff]  ;;  %v1094_v25 = vld [vmem:[%s2298_s7 + $0x170] sm:$0xff] }
  0xd6   : > { %v844_v4 = vrot.slane %v825_v13, 1  ;;  %v683_v32 = vmul.f32 %v1795_v62, %v596_v38  ;;  %v843_v34 = vrot.slane %v821_v26, 1  ;;  %v762_v46 = vmul.f32 %v1821_v17, %v600_v48  ;;  %1136 = vmatpush.msrb.mxu2 %v1095_v23 }
  0xd7   : > { %783 = vrot.lane.b32.xlu0 %v773_v54, %s1466_s22  ;;  %v2000_v9 = vsel %vm878_vm11, %v879_v27, %v880_v28  ;;  %v978_v8 = vmul.f32 %v968_v31, %v596_v38  ;;  %v915_v35 = vmul.f32 %v1832_v30, %v596_v38  ;;  %v936_v36 = vsel %vm878_vm11, %v934_v12, %v935_v60  ;;  %v1093_v60 = vld [vmem:[%s2298_s7 + $0x168] sm:$0xff] }
  0xd8   : > { %649 = vrot.lane.b32.xlu1 %v638_v51, %s1466_s22  ;;  %v845_v39 = vsel %vm721_vm10, %v843_v34, %v844_v4  ;;  %v982_v41 = vmul.f32 %v968_v31, %v600_v48  ;;  %v919_v43 = vmul.f32 %v1832_v30, %v600_v48  ;;  %v758_v62 = vmul.f32 %v1821_v17, %v596_v38  ;;  %v1092_v4 = vld [vmem:[%s2298_s7 + $0x160] sm:$0xff] }
  0xd9   : > { %v969_v42 = vsel %vm673_vm5, %v964_v10, %v966_v57  ;;  %v781_v44 = vrot.slane %v762_v46, 1  ;;  %v1000_v45 = vrot.slane %v978_v8, 2  ;;  %v937_v24 = vrot.slane %v915_v35, 2  ;;  %1137 = vmatpush.msrb.mxu2 %v1094_v25  ;;  %v1082_v25 = vld [vmem:[%s2298_s7 + $0x110] sm:$0xff] }
  0xda   : > { %940 = vrot.lane.b32.xlu2 %v930_v20, %s1466_s22  ;;  %v1001_v47 = vrot.slane %v982_v41, 2  ;;  %v938_v51 = vrot.slane %v919_v43, 2  ;;  %v780_v53 = vrot.slane %v758_v62, 1  ;;  %v970_v54 = vsel %vm673_vm5, %v966_v57, %v968_v31 }
  0xdb   : > { %v975_v20 = vmul.f32 %v964_v10, %v1874_v11  ;;  %v976_v30 = vmul.f32 %v969_v42, %v1842_v37  ;;  %v981_v48 = vmul.f32 %v970_v54, %v1901_v29  ;;  %v979_v17 = vmul.f32 %v964_v10, %v1915_v40  ;;  %1138 = vmatpush.msrb.mxu2 %v1093_v60  ;;  %v1090_v10 = vld [vmem:[%s2298_s7 + $0x150] sm:$0xff] }
  0xdc   : > { %v782_v49 = vsel %vm721_vm10, %v780_v53, %v781_v44  ;;  %v980_v38 = vmul.f32 %v969_v42, %v1863_v59  ;;  %v1002_v55 = vsel %vm878_vm11, %v1000_v45, %v1001_v47  ;;  %v939_v58 = vsel %vm878_vm11, %v937_v24, %v938_v51  ;;  %v1089_v44 = vld [vmem:[%s2298_s7 + $0x148] sm:$0xff]  ;;  %v1088_v47 = vld [vmem:[%s2298_s7 + $0x140] sm:$0xff] }
  0xdd   : > { %v977_v57 = vmul.f32 %v970_v54, %v1867_v6  ;;  %v998_v7 = vrot.slane %v981_v48, 2  ;;  %v991_v29 = vrot.slane %v975_v20, 2  ;;  %v992_v50 = vrot.slane %v979_v17, 2  ;;  %1139 = vmatpush.msrb.mxu2 %v1092_v4  ;;  %v1061_v45 = vld [vmem:[%s2298_s7 + $0x68] sm:$0xff]  ;;  %v1060_v51 = vld [vmem:[%s2298_s7 + $0x60] sm:$0xff]  ;;  %v1087_v54 = vld [vmem:[%s2298_s7 + $0x138] sm:$0xff] }
  0xde   : > { %v994_v63 = vrot.slane %v976_v30, 2  ;;  %v995_v13 = vrot.slane %v980_v38, 2  ;;  %v608_v22 = vperm.slane %v1605_v3, 0  ;;  %v607_v28 = vperm.slane %v1717_v33, 0  ;;  %v1079_v33 = vld [vmem:[%s2298_s7 + $0xf8] sm:$0xff]  ;;  %v1076_v53 = vld [vmem:[%s2298_s7 + $0xe0] sm:$0xff] }
  0xdf   : > { %694 = vrot.lane.b32.xlu0 %v683_v32, %s1465_s28  ;;  %v997_v40 = vrot.slane %v977_v57, 2  ;;  %v993_v14 = vsel %vm878_vm11, %v991_v29, %v992_v50  ;;  %v1091_v32 = vld [vmem:[%s2298_s7 + $0x158] sm:$0xff]  ;;  %1116 = vmatpush.msrb.mxu1 %v1079_v33  ;;  %v1074_v29 = vld [vmem:[%s2298_s7 + $0xd0] sm:$0xff]  ;;  %v1085_v50 = vld [vmem:[%s2298_s7 + $0x128] sm:$0xff] }
  0xe0   : > { %944 = vrot.lane.b32.xlu1 %v936_v36, %s1466_s22  ;;  %v996_v1 = vsel %vm878_vm11, %v994_v63, %v995_v13  ;;  %v610_v8 = vmul.f32 %v607_v28, %v1874_v11  ;;  %1140 = vmatpush.msrb.mxu2 %v1091_v32  ;;  %v1062_v11 = vld [vmem:[%s2298_s7 + $0x70] sm:$0xff]  ;;  %v1059_v48 = vld [vmem:[%s2298_s7 + $0x58] sm:$0xff]  ;;  %v1057_v63 = vld [vmem:[%s2298_s7 + $0x48] sm:$0xff] }
  0xe1   : > { %v999_v59 = vsel %vm878_vm11, %v997_v40, %v998_v7  ;;  %v1058_v7 = vld [vmem:[%s2298_s7 + $0x50] sm:$0xff]  ;;  %v1073_v13 = vld [vmem:[%s2298_s7 + $0xc8] sm:$0xff]  ;;  %v1084_v40 = vld [vmem:[%s2298_s7 + $0x120] sm:$0xff] }
  0xe2   : > { %852 = vrot.lane.b32.xlu2 %v845_v39, %s1465_s28  ;;  %1141 = vmatpush.msrb.mxu2 %v1090_v10  ;;  %v1070_v33 = vld [vmem:[%s2298_s7 + $0xb0] sm:$0xff] }
  0xe4   : > { %1142 = vmatpush.msrb.mxu2 %v1089_v44  ;;  %v1065_v44 = vld [vmem:[%s2298_s7 + $0x88] sm:$0xff] }
  0xe6   : > { %1143 = vmatpush.msrb.mxu2 %v1088_v47 }
  0xe7   : > { %789 = vrot.lane.b32.xlu0 %v782_v49, %s1466_s22  ;;  %v1075_v49 = vld [vmem:[%s2298_s7 + $0xd8] sm:$0xff] }
  0xe8   : > { %1009 = vrot.lane.b32.xlu1 %v1002_v55, %s1465_s28  ;;  %v1086_v55 = vld [vmem:[%s2298_s7 + $0x130] sm:$0xff]  ;;  %1144 = vmatpush.msrb.mxu2 %v1087_v54  ;;  %v1020_v54 = vld [vmem:[%s2296_s5] sm:$0x7] }
  0xea   : > { %946 = vrot.lane.b32.xlu2 %v939_v58, %s1466_s22  ;;  %1145 = vmatpush.msrb.mxu2 %v1086_v55  ;;  %v1024_v55 = vperm.slane %v1020_v54, 2 }
  0xec   : > { %1146 = vmatpush.msrb.mxu2 %v1085_v50 }
  0xee   : > { %1147 = vmatpush.msrb.mxu2 %v1084_v40 }
  0xef   : > { %1007 = vrot.lane.b32.xlu0 %v999_v59, %s1465_s28 }
  0xf0   : > { %1003 = vrot.lane.b32.xlu1 %v993_v14, %s1465_s28  ;;  %v1056_v14 = vld [vmem:[%s2298_s7 + $0x40] sm:$0xff] }
  0xf2   : > { %1005 = vrot.lane.b32.xlu2 %v996_v1, %s1465_s28  ;;  %v1072_v1 = vld [vmem:[%s2298_s7 + $0xc0] sm:$0xff]  ;;  %s366_s28 = scalar_lea.vmem [#allocation2], %s1267_s0  ;;  %s1387_s0 = scalar_lea.hbm %s2301_s10, 32 }
  0xf3   : > { %p1389_p6 = scmp.lt.s32.totalorder %s1387_s0, %s1383_s30 }
  0xf5   : > { %p1390_p7 = por %p1389_p6, %p1388_p5 }
  0xf7   : > { %942 = vrot.lane.b32.xlu0 %v1948_v2, %s1466_s22  ;;  %v611_v2 = vmul.f32 %v608_v22, %v1842_v37  ;;  %v1063_v37 = vld [vmem:[%s2298_s7 + $0x78] sm:$0xff]  ;;  %s1183_s22 = sshll.u32 %s366_s28, 4  ;;  %p1391_p9 = pnand %p1390_p7, %p1386_p4  ;;  %s1184_s22 = int_to_ptr.vmem [resolvable:$true] %s1183_s22 }
  0xf8   : > { %1096 = vmatpush.msra.mxu0 %v1063_v37  ;;  %v1071_v22 = vld [vmem:[%s2298_s7 + $0xb8] sm:$0xff] }
  0xfa   : > { %1097 = vmatpush.msra.mxu0 %v1062_v11  ;;  %v1066_v11 = vld [vmem:[%s2298_s7 + $0x90] sm:$0xff] }
  0xfc   : > { %1098 = vmatpush.msra.mxu0 %v1061_v45  ;;  %v1048_v45 = vld [vmem:[%s2298_s7] sm:$0xff] }
  0xfe   : > { %1099 = vmatpush.msra.mxu0 %v1060_v51 }
 0x100   : > { %1100 = vmatpush.msra.mxu0 %v1059_v48 }
 0x102   : > { %1101 = vmatpush.msra.mxu0 %v1058_v7 }
 0x104   : > { %1102 = vmatpush.msra.mxu0 %v1057_v63 }
 0x106   : > { %1103 = vmatpush.msra.mxu0 %v1056_v14  ;;  %v1023_v14 = vperm.slane %v1020_v54, 1 }
 0x112   : > { %v646_v16 = vpop.permute.xlu2 %645 }
 0x11a   : > { %v2034_v21 = vpop.permute.xlu2 %692 }
 0x124   : > { %v2067_v46 = vpop.permute.xlu2 %787 }
 0x12a   : > { %v691_v19 = vpop.permute.xlu1 %690 }
 0x12b   : > { %v698_v12 = vsel %vm696_vm13, %v691_v19, %v2034_v21 }
 0x12c   : > { %v847_v20 = vpop.permute.xlu2 %846 }
 0x131   : > { %v2043_v61 = vpop.permute.xlu0 %647 }
 0x132   : > { %v653_v26 = vsel %vm651_vm12, %v646_v16, %v2043_v61  ;;  %v644_v3 = vpop.permute.xlu1 %643 }
 0x133   : > { %v659_v27 = vadd.f32 %v653_v26, %v611_v2  ;;  %v652_v34 = vsel %vm651_vm12, %v644_v3, %v646_v16  ;;  %v1083_v16 = vld [vmem:[%s2298_s7 + $0x118] sm:$0xff]  ;;  %v609_v3 = vperm.slane %v1649_v15, 0  ;;  %v1054_v15 = vld [vmem:[%s2298_s7 + $0x30] sm:$0xff] }
 0x134   : > { %v658_v36 = vadd.f32 %v652_v34, %v610_v8  ;;  %v2158_v2 = vpop.permute.xlu2 %940  ;;  %1148 = vmatpush.msrb.mxu2 %v1083_v16  ;;  %v1052_v8 = vld [vmem:[%s2298_s7 + $0x20] sm:$0xff] }
 0x135   : > { %v704_v31 = vadd.f32 %v698_v12, %v659_v27  ;;  %v612_v12 = vmul.f32 %v609_v3, %v1867_v6  ;;  %v1053_v6 = vld [vmem:[%s2298_s7 + $0x28] sm:$0xff] }
 0x136   : > { %1149 = vmatpush.msrb.mxu2 %v1082_v25 }
 0x137   : > { %v735_v35 = vadd.f32 %v1964_v0, %v704_v31  ;;  %v1078_v0 = vld [vmem:[%s2298_s7 + $0xf0] sm:$0xff]  ;;  %v1081_v31 = vld [vmem:[%s2298_s7 + $0x108] sm:$0xff] }
 0x138   : > { %1117 = vmatpush.msrb.mxu1 %v1078_v0  ;;  %1150 = vmatpush.msrb.mxu2 %v1081_v31  ;;  %v1049_v0 = vld [vmem:[%s2298_s7 + $0x8] sm:$0xff] }
 0x139   : > { %v689_v39 = vpop.permute.xlu0 %688 }
 0x13a   : > { %v697_v41 = vsel %vm696_vm13, %v689_v39, %v691_v19  ;;  %v786_v43 = vpop.permute.xlu1 %785  ;;  %v1051_v39 = vld [vmem:[%s2298_s7 + $0x18] sm:$0xff] }
 0x13b   : > { %v703_v62 = vadd.f32 %v697_v41, %v658_v36  ;;  %v792_v24 = vsel %vm651_vm12, %v786_v43, %v2067_v46  ;;  %v1067_v41 = vld [vmem:[%s2298_s7 + $0x98] sm:$0xff] }
 0x13c   : > { %v798_v17 = vadd.f32 %v792_v24, %v735_v35  ;;  %v1068_v35 = vld [vmem:[%s2298_s7 + $0xa0] sm:$0xff] }
 0x13d   : > { %v734_v42 = vadd.f32 %v1971_v52, %v703_v62  ;;  %v1077_v52 = vld [vmem:[%s2298_s7 + $0xe8] sm:$0xff] }
 0x13e   : > { %1118 = vmatpush.msrb.mxu1 %v1077_v52  ;;  %v1064_v52 = vld [vmem:[%s2298_s7 + $0x80] sm:$0xff] }
 0x140   : > { %1119 = vmatpush.msrb.mxu1 %v1076_v53 }
 0x141   : > { %v849_v30 = vpop.permute.xlu0 %848 }
 0x142   : > { %v2111_v38 = vpop.permute.xlu1 %850  ;;  %1120 = vmatpush.msrb.mxu1 %v1075_v49  ;;  %v854_v28 = vsel %vm696_vm13, %v847_v20, %v849_v30 }
 0x143   : > { %v855_v58 = vsel %vm696_vm13, %v849_v30, %v2111_v38 }
 0x144   : > { %v861_v57 = vadd.f32 %v855_v58, %v798_v17  ;;  %1121 = vmatpush.msrb.mxu1 %v1074_v29 }
 0x146   : > { %v2137_v59 = vadd.f32 %v1997_v56, %v861_v57  ;;  %1122 = vmatpush.msrb.mxu1 %v1073_v13  ;;  %v1055_v56 = vld [vmem:[%s2298_s7 + $0x38] sm:$0xff] }
 0x147   : > { %1104 = vmatpush.msra.mxu0 %v1055_v56 }
 0x148   : > { %1123 = vmatpush.msrb.mxu1 %v1072_v1 }
 0x149   : > { %v784_v19 = vpop.permute.xlu0 %783  ;;  %1105 = vmatpush.msra.mxu0 %v1054_v15 }
 0x14a   : > { %v791_v23 = vsel %vm651_vm12, %v784_v19, %v786_v43  ;;  %v650_v27 = vpop.permute.xlu1 %649  ;;  %1124 = vmatpush.msrb.mxu1 %v1071_v22  ;;  %v853_v43 = vpop.permute.xlu2 %852 }
 0x14b   : > { %v797_v26 = vadd.f32 %v791_v23, %v734_v42  ;;  %v654_v4 = vsel %vm651_vm12, %v2043_v61, %v650_v27  ;;  %v1080_v61 = vld [vmem:[%s2298_s7 + $0x100] sm:$0xff]  ;;  %1106 = vmatpush.msra.mxu0 %v1053_v6  ;;  %v856_v51 = vsel %vm696_vm13, %v2111_v38, %v853_v43  ;;  %v1022_v23 = vperm.slane %v1020_v54, 0 }
 0x14c   : > { %1125 = vmatpush.msrb.mxu1 %v1070_v33  ;;  %v660_v32 = vadd.f32 %v654_v4, %v612_v12  ;;  %1151 = vmatpush.msrb.mxu2 %v1080_v61 }
 0x14d   : > { %v860_v60 = vadd.f32 %v854_v28, %v797_v26  ;;  %1107 = vmatpush.msra.mxu0 %v1052_v8 }
 0x14f   : > { %v2166_v37 = vadd.f32 %v2000_v9, %v860_v60  ;;  %v1069_v9 = vld [vmem:[%s2298_s7 + $0xa8] sm:$0xff]  ;;  %1108 = vmatpush.msra.mxu0 %v1051_v39  ;;  %v1366_v39 = vld [vmem:[%s1685_s25] sm:$0xff] }
 0x150   : > { %1126 = vmatpush.msrb.mxu1 %v1069_v9 }
 0x151   : > { %v695_v34 = vpop.permute.xlu0 %694 }
 0x152   : > { %v699_v10 = vsel %vm696_vm13, %v2034_v21, %v695_v34  ;;  %1127 = vmatpush.msrb.mxu1 %v1068_v35  ;;  %v945_v62 = vpop.permute.xlu1 %944  ;;  %v1050_v21 = vld [vmem:[%s2298_s7 + $0x10] sm:$0xff]  ;;  %v947_v20 = vpop.permute.xlu2 %946  ;;  %v1365_v35 = vld [vmem:[%s2300_s9] ss:$0 sm:$0xff] }
 0x153   : > { %v705_v36 = vadd.f32 %v699_v10, %v660_v32  ;;  %1109 = vmatpush.msra.mxu0 %v1050_v21  ;;  %v950_v49 = vsel %vm651_vm12, %v945_v62, %v947_v20  ;;  %v1364_v32 = vld [vmem:[%s2299_s8] ss:$0 sm:$0xff] }
 0x154   : > { %1128 = vmatpush.msrb.mxu1 %v1067_v41 }
 0x155   : > { %v736_v42 = vadd.f32 %v1985_v18, %v705_v36  ;;  %1110 = vmatpush.msra.mxu0 %v1049_v0 }
 0x156   : > { %1129 = vmatpush.msrb.mxu1 %v1066_v11 }
 0x157   : > { %1111 = vmatpush.msra.mxu0 %v1048_v45 }
 0x158   : > { %1130 = vmatpush.msrb.mxu1 %v1065_v44 }
 0x159   : > { %v790_v18 = vpop.permute.xlu0 %789 }
 0x15a   : > { %v793_v47 = vsel %vm651_vm12, %v2067_v46, %v790_v18  ;;  %1131 = vmatpush.msrb.mxu1 %v1064_v52  ;;  %v1010_v30 = vpop.permute.xlu1 %1009  ;;  %v1031_v46 = vld [vmem:[%s2297_s6] sm:$0x7]  ;;  %v1006_v16 = vpop.permute.xlu2 %1005 }
 0x15b   : > { %v799_v24 = vadd.f32 %v793_v47, %v736_v42  ;;  %v1035_v7 = vperm.slane %v1031_v46, 2  ;;  %v1034_v28 = vperm.slane %v1031_v46, 1 }
 0x15d   : > { %v862_v53 = vadd.f32 %v856_v51, %v799_v24 }
 0x15f   : > { %v893_v48 = vadd.f32 %v1994_v5, %v862_v53 }
 0x161   : > { %v956_v17 = vadd.f32 %v950_v49, %v893_v48  ;;  %v1008_v38 = vpop.permute.xlu0 %1007 }
 0x162   : > { %v1013_v58 = vsel %vm696_vm13, %v1008_v38, %v1010_v30  ;;  %v1004_v63 = vpop.permute.xlu1 %1003  ;;  %v1012_v25 = vsel %vm696_vm13, %v1006_v16, %v1008_v38 }
 0x163   : > { %v1019_v57 = vadd.f32 %v1013_v58, %v956_v17  ;;  %v1011_v26 = vsel %vm696_vm13, %v1004_v63, %v1006_v16 }
 0x165   : > { %v1030_v29 = vmul.f32 %v1024_v55, %v1019_v57 }
 0x167   : > { %v1041_v50 = vadd.f32 %v1035_v7, %v1030_v29 }
 0x169   : > { %v943_v13 = vpop.permute.xlu0 %942  ;;  %v1044_v40 = vmax.f32 %v1041_v50, 0.0 }
 0x16a   : > { %v948_v5 = vsel %vm651_vm12, %v2158_v2, %v943_v13  ;;  %v949_v1 = vsel %vm651_vm12, %v943_v13, %v945_v62  ;;  %v1033_v2 = vperm.slane %v1031_v46, 0 }
 0x16b   : > { %v954_v19 = vadd.f32 %v948_v5, %v2166_v37  ;;  %v955_v56 = vadd.f32 %v949_v1, %v2137_v59  ;;  %v1047_v22 = vmin.f32 %v1044_v40, 6.0 }
 0x16d   : > { %v1017_v3 = vadd.f32 %v1011_v26, %v954_v19  ;;  %v1018_v27 = vadd.f32 %v1012_v25, %v955_v56  ;;  %1152 = vmatmul.f32.vlgmr.msrb.gmra.mxu2 %v1047_v22 }
 0x16f   : > { %v1029_v60 = vmul.f32 %v1023_v14, %v1018_v27  ;;  %v1028_v4 = vmul.f32 %v1022_v23, %v1017_v3 }
 0x171   : > { %v1039_v12 = vadd.f32 %v1033_v2, %v1028_v4  ;;  %v1040_v37 = vadd.f32 %v1034_v28, %v1029_v60 }
 0x173   : > { %v1042_v15 = vmax.f32 %v1039_v12, 0.0  ;;  %v1043_v59 = vmax.f32 %v1040_v37, 0.0 }
 0x175   : > { %v1045_v33 = vmin.f32 %v1042_v15, 6.0  ;;  %v1046_v31 = vmin.f32 %v1043_v59, 6.0 }
 0x177   : > { %1112 = vmatmul.f32.vlgmr.msra.gmra.mxu0 %v1045_v33  ;;  %1132 = vmatmul.f32.vlgmr.msrb.gmra.mxu1 %v1046_v31 }
 0x1f0   : > { %v1153_v34 = vpop.f32.mrf.mxu2 }
 0x1f4   : > { %v1113_v6 = vpop.f32.mrf.mxu0  ;;  %v1133_v9 = vpop.f32.mrf.mxu1 }
 0x1f5   : > { %v1134_v61 = vadd.f32 %v1133_v9, %v1113_v6 }
 0x1f7   : > { %v1154_v8 = vadd.f32 %v1153_v34, %v1134_v61 }
 0x1f9   : > { %v1160_v10 = vmul.f32 %v1364_v32, %v1154_v8 }
 0x1fb   : > { %v1165_v36 = vadd.f32 %v1365_v35, %v1160_v10 }
 0x1fd   : > { %v1166_v41 = vadd.f32 %v1366_v39, %v1165_v36 }
 0x1ff   : > { %1167 = vst.msk [vmem:[%s366_s28] sm:$0xff] %vm426_vm1, %v1166_v41 }
 0x200   : > { %1394 = shalt.err (!%p1391_p9)
}
 0x201   : > { %1286 = dma.vmem_to_hbm [thread:$0]  (%p1573_p3), %s1184_s22, 128, %s1186_s29, %s1169_s20  }
 0x202 PF: > { %s2337_s25 = sld [smem:[#allocation9_spill]] }
 0x203   : > { %s2338_s24 = sld [smem:[#allocation5_spill]] }
 0x208   : > { %p1292_p10 = scmp.ge.s32.totalorder %s2337_s25, 2 }
 0x209   : > { %s1197_s23 = sand.u32 1, %s2338_s24  }
 0x20a   : > { %p1289_p11 = pnand %p1292_p10, %p1582_p8  ;;  %s1198_s15 = scalar_lea.sflag [#allocation3], %s1197_s23 }
 0x20c   : > { %p1290_p12 = pneg %p1289_p11 }
 0x20e   : > { %1428 = dma.done.wait (%p1290_p12), %s1198_s15, 128  }
 0x20f   : > { %1430 = vsyncadd (%p1290_p12), %s1198_s15, 4294967168  ;;  %s23_s20 = sadd.s32 1, %s2337_s25   ;;  %s2340_s19 = sld [smem:[#allocation6_spill]] }
 0x210   : > { %p20_p13 = scmp.ge.s32.totalorder %s23_s20, 6   ;;  %s2341_s15 = sld [smem:[#allocation13_spill]] }
 0x211   : > { %s2342_s16 = sld [smem:[#allocation7_spill]]  ;;  %s2346_s13 = smov %s1437_s14 }
 0x212   : > { %s2343_s17 = sld [smem:[#allocation8_spill]] }
 0x213   : > { %s2344_s18 = sld [smem:[#allocation10_spill]] }
 0x214   : > { %s2345_s26 = sld [smem:[#allocation11_spill]] }
 0x215   : > { %s2347_s14 = smov %s2340_s19 }
 0x216   :  { %22 = sbr.rel (!%p20_p13) target bundleno = 7 (0x7), region = 98 }
 0x21a   : > { %s2348_s19 = smov %s2345_s26 }
 0x21b   :  { %1204 = vsyncpa [#allocation3], 1 }
 0x21c   :  { %1206 = vsyncpa [#allocation3 + $0x1], 1 }

</bundles_post_ra>
